<compile_context>
chip_gen: v6e
topology: v6e:2x2x1
jax: 0.10.0
libtpu: 0.0.40
codegen_flags: <defaults>
</compile_context>

<pallas_src>
import jax
import jax.numpy as jnp
from jax import lax
from jax.experimental import pallas as pl
from jax.experimental.pallas import tpu as pltpu

LANE = 128


def _round_up(n, m):
    return ((n + m - 1) // m) * m


def mlp_kernel(x_ref, w1_ref, b1_ref, w2_ref, b2_ref, w3_ref, b3_ref, o_ref):
    # Layer 1: Linear(F -> H1) + ReLU   (Dropout = identity in eval mode)
    h1 = jnp.dot(x_ref[...], w1_ref[...], preferred_element_type=jnp.float32)
    h1 = jnp.maximum(h1 + b1_ref[...], 0.0).astype(jnp.bfloat16)
    # Layer 2: Linear(H1 -> H2) + ReLU  (Dropout = identity in eval mode)
    h2 = jnp.dot(h1, w2_ref[...], preferred_element_type=jnp.float32)
    h2 = jnp.maximum(h2 + b2_ref[...], 0.0).astype(jnp.bfloat16)
    # Layer 3: Linear(H2 -> 1), computed transposed so the result is (1, TB):
    #   out_t[0, m] = sum_k w3_row[0, k] * h2[m, k]
    out_t = lax.dot_general(
        w3_ref[...], h2,
        dimension_numbers=(((1,), (1,)), ((), ())),
        preferred_element_type=jnp.float32,
    )  # (1, TB) lane-dense
    o_ref[...] = out_t + b3_ref[...]


def skorch_mlp_forward(x, prepared_params, tb_max=1024):
    """x: [B, F] float32. prepared_params: output of prepare_params (padded bf16 weights)."""
    w1, b1, w2, b2, w3r, b3 = (
        prepared_params[k] for k in ("w1", "b1", "w2", "b2", "w3r", "b3")
    )
    B, F = x.shape
    Fp, H1 = w1.shape
    H2p = w2.shape[1]

    # Batch tile: multiple of 128 lanes; 512-1024 amortizes per-grid-step overhead,
    # tiny VMEM footprint (x tile bf16 = TB*Fp*2 double-buffered) -> safe even on v7x's 64 MiB.
    tb = min(tb_max, _round_up(B, LANE))
    b_pad = _round_up(B, tb)
    grid = (b_pad // tb,)

    # Pad batch / features and cast activations to bf16 (accumulation stays f32 in-kernel).
    xp = jnp.zeros((b_pad, Fp), jnp.bfloat16).at[:B, :F].set(x.astype(jnp.bfloat16))

    flops = 2 * b_pad * (Fp * H1 + H1 * H2p + H2p)
    bytes_accessed = (
        xp.size * 2
        + (w1.size + w2.size + w3r.size) * 2
        + (b1.size + b2.size + b3.size) * 4
        + b_pad * 4
    )

    out = pl.pallas_call(
        mlp_kernel,
        out_shape=jax.ShapeDtypeStruct((1, b_pad), jnp.float32),
        grid_spec=pltpu.PrefetchScalarGridSpec(
            num_scalar_prefetch=0,
            grid=grid,
            in_specs=[
                pl.BlockSpec((tb, Fp), lambda i: (i, 0)),     # x: streams per batch tile
                pl.BlockSpec((Fp, H1), lambda i: (0, 0)),     # weights/biases: VMEM-resident
                pl.BlockSpec((1, H1), lambda i: (0, 0)),
                pl.BlockSpec((H1, H2p), lambda i: (0, 0)),
                pl.BlockSpec((1, H2p), lambda i: (0, 0)),
                pl.BlockSpec((1, H2p), lambda i: (0, 0)),
                pl.BlockSpec((1, 1), lambda i: (0, 0)),
            ],
            out_specs=pl.BlockSpec((1, tb), lambda i: (0, i)),  # lane-dense output tile
        ),
        compiler_params=pltpu.CompilerParams(
            dimension_semantics=("parallel",),
        ),
        cost_estimate=pl.CostEstimate(
            flops=flops, transcendentals=0, bytes_accessed=bytes_accessed
        ),
    )(xp, w1, b1, w2, b2, w3r, b3)

    # transpose-back + .squeeze(-1) of the PyTorch forward
    return out[0, :B]


def init_params(key, input_features, hidden_size=128, num_layers=2):
    """Deterministic kaiming_normal_(fan_in, relu) weights, zero biases (as in _initialize_weights).
    Weights stored [in, out] (transposed from PyTorch's [out, in])."""
    dims = [input_features, hidden_size]
    h = hidden_size
    for _ in range(num_layers - 1):
        dims.append(h // 2)
        h //= 2
    dims.append(1)  # final Linear(hidden, 1)
    params = {}
    keys = jax.random.split(key, len(dims) - 1)
    for li in range(len(dims) - 1):
        fan_in, fan_out = dims[li], dims[li + 1]
        std = (2.0 / fan_in) ** 0.5  # kaiming normal, fan_in, relu gain
        params[f"w{li + 1}"] = std * jax.random.normal(
            keys[li], (fan_in, fan_out), dtype=jnp.float32
        )
        params[f"b{li + 1}"] = jnp.zeros((1, fan_out), dtype=jnp.float32)
    return params


def prepare_params(params):
    """Zero-pad feature dims to multiples of 128 lanes and cast weights to bf16 (once, outside kernel)."""
    w1, b1 = params["w1"], params["b1"]  # (F, H1), (1, H1)
    w2, b2 = params["w2"], params["b2"]  # (H1, H2), (1, H2)
    w3, b3 = params["w3"], params["b3"]  # (H2, 1), (1, 1)
    F, H1 = w1.shape
    H2 = w2.shape[1]
    Fp = max(_round_up(F, LANE), LANE)
    H1p = max(_round_up(H1, LANE), LANE)
    H2p = max(_round_up(H2, LANE), LANE)

    w1p = jnp.zeros((Fp, H1p), jnp.float32).at[:F, :H1].set(w1)
    b1p = jnp.zeros((1, H1p), jnp.float32).at[:, :H1].set(b1)
    w2p = jnp.zeros((H1p, H2p), jnp.float32).at[:H1, :H2].set(w2)
    b2p = jnp.zeros((1, H2p), jnp.float32).at[:, :H2].set(b2)
    w3r = jnp.zeros((1, H2p), jnp.float32).at[0, :H2].set(w3[:, 0])  # stored as a row
    return {
        "w1": w1p.astype(jnp.bfloat16),
        "b1": b1p,
        "w2": w2p.astype(jnp.bfloat16),
        "b2": b2p,
        "w3r": w3r.astype(jnp.bfloat16),
        "b3": b3.astype(jnp.float32),
    }


if __name__ == "__main__":
    key = jax.random.PRNGKey(0)
    kx, kp = jax.random.split(key)

    batch = 8
    input_features = 32
    hidden_size = 128
    num_layers = 2  # -> layers: 32->128, 128->64, 64->1

    x = jax.random.normal(kx, (batch, input_features), dtype=jnp.float32)
    params = init_params(kp, input_features, hidden_size, num_layers)
    pp = prepare_params(params)

    fwd = jax.jit(lambda xx: skorch_mlp_forward(xx, pp))
    y = jax.block_until_ready(fwd(x))
    assert y.shape == (batch,)

    # Reference 1: emulate the kernel's bf16-input / f32-accumulate math in plain JAX.
    Fp = pp["w1"].shape[0]
    xq = (
        jnp.zeros((batch, Fp), jnp.float32)
        .at[:, :input_features]
        .set(x.astype(jnp.bfloat16).astype(jnp.float32))
    )
    w1f = pp["w1"].astype(jnp.float32)
    w2f = pp["w2"].astype(jnp.float32)
    w3f = pp["w3r"].astype(jnp.float32)
    h = jnp.maximum(xq @ w1f + pp["b1"], 0.0).astype(jnp.bfloat16).astype(jnp.float32)
    h = jnp.maximum(h @ w2f + pp["b2"], 0.0).astype(jnp.bfloat16).astype(jnp.float32)
    ref_emu = (h @ w3f.T + pp["b3"])[:, 0]
    assert jnp.allclose(y, ref_emu, atol=1e-2, rtol=1e-2)

    # Reference 2: original f32 eval-mode forward (dropout = identity); loose tol for bf16 inputs.
    h = jnp.maximum(x @ params["w1"] + params["b1"], 0.0)
    h = jnp.maximum(h @ params["w2"] + params["b2"], 0.0)
    ref_f32 = (h @ params["w3"] + params["b3"])[:, 0]
    assert jnp.allclose(y, ref_f32, atol=1e-1, rtol=1e-1)

    print("KERNEL_OK")
</pallas_src>

<mosaic_0001>
module attributes {stable_mosaic.version = 11 : i64} {
  func.func @mlp_kernel(%arg0: i32, %arg1: memref<128x128xbf16, #tpu.memory_space<vmem>>, %arg2: memref<128x128xbf16, #tpu.memory_space<vmem>>, %arg3: memref<1x128xf32, #tpu.memory_space<vmem>>, %arg4: memref<128x128xbf16, #tpu.memory_space<vmem>>, %arg5: memref<1x128xf32, #tpu.memory_space<vmem>>, %arg6: memref<1x128xbf16, #tpu.memory_space<vmem>>, %arg7: memref<1x1xf32, #tpu.memory_space<vmem>>, %arg8: memref<1x128xf32, #tpu.memory_space<vmem>>) attributes {dimension_semantics = [#tpu.dimension_semantics<parallel>], iteration_bounds = array<i64: 1>, scalar_prefetch = 0 : i64, scratch_operands = 0 : i64, tpu.core_type = #tpu.core_type<tc>, window_params = [{transform_indices = @transform_0, window_bounds = array<i64: 128, 128>}, {pipeline_mode = #tpu.pipeline_mode<synchronous>, transform_indices = @transform_1, window_bounds = array<i64: 128, 128>}, {pipeline_mode = #tpu.pipeline_mode<synchronous>, transform_indices = @transform_2, window_bounds = array<i64: 1, 128>}, {pipeline_mode = #tpu.pipeline_mode<synchronous>, transform_indices = @transform_3, window_bounds = array<i64: 128, 128>}, {pipeline_mode = #tpu.pipeline_mode<synchronous>, transform_indices = @transform_4, window_bounds = array<i64: 1, 128>}, {pipeline_mode = #tpu.pipeline_mode<synchronous>, transform_indices = @transform_5, window_bounds = array<i64: 1, 128>}, {pipeline_mode = #tpu.pipeline_mode<synchronous>, transform_indices = @transform_6, window_bounds = array<i64: 1, 1>}, {transform_indices = @transform_7, window_bounds = array<i64: 1, 128>}]} {
    %c0 = arith.constant 0 : index
    %c0_0 = arith.constant 0 : index
    %0 = vector.load %arg1[%c0, %c0_0] : memref<128x128xbf16, #tpu.memory_space<vmem>>, vector<128x128xbf16>
    %c0_1 = arith.constant 0 : index
    %c0_2 = arith.constant 0 : index
    %1 = vector.load %arg2[%c0_1, %c0_2] : memref<128x128xbf16, #tpu.memory_space<vmem>>, vector<128x128xbf16>
    %cst = arith.constant dense<0.000000e+00> : vector<128x128xf32>
    %2 = tpu.matmul %0, %1, %cst {dimension_numbers = #tpu.dot_dimension_numbers<[1], [0], [0], [1], [0, 0, 1, 1], [], []>} : vector<128x128xbf16>, vector<128x128xbf16>, vector<128x128xf32> -> vector<128x128xf32>
    %c0_3 = arith.constant 0 : index
    %c0_4 = arith.constant 0 : index
    %3 = vector.load %arg3[%c0_3, %c0_4] : memref<1x128xf32, #tpu.memory_space<vmem>>, vector<1x128xf32>
    %4 = vector.broadcast %3 : vector<1x128xf32> to vector<128x128xf32>
    %5 = arith.addf %2, %4 : vector<128x128xf32>
    %cst_5 = arith.constant 0.000000e+00 : f32
    %6 = vector.broadcast %cst_5 : f32 to vector<128x128xf32>
    %7 = arith.maximumf %5, %6 : vector<128x128xf32>
    %8 = arith.truncf %7 : vector<128x128xf32> to vector<128x128xbf16>
    %c0_6 = arith.constant 0 : index
    %c0_7 = arith.constant 0 : index
    %9 = vector.load %arg4[%c0_6, %c0_7] : memref<128x128xbf16, #tpu.memory_space<vmem>>, vector<128x128xbf16>
    %cst_8 = arith.constant dense<0.000000e+00> : vector<128x128xf32>
    %10 = tpu.matmul %8, %9, %cst_8 {dimension_numbers = #tpu.dot_dimension_numbers<[1], [0], [0], [1], [0, 0, 1, 1], [], []>} : vector<128x128xbf16>, vector<128x128xbf16>, vector<128x128xf32> -> vector<128x128xf32>
    %c0_9 = arith.constant 0 : index
    %c0_10 = arith.constant 0 : index
    %11 = vector.load %arg5[%c0_9, %c0_10] : memref<1x128xf32, #tpu.memory_space<vmem>>, vector<1x128xf32>
    %12 = vector.broadcast %11 : vector<1x128xf32> to vector<128x128xf32>
    %13 = arith.addf %10, %12 : vector<128x128xf32>
    %cst_11 = arith.constant 0.000000e+00 : f32
    %14 = vector.broadcast %cst_11 : f32 to vector<128x128xf32>
    %15 = arith.maximumf %13, %14 : vector<128x128xf32>
    %16 = arith.truncf %15 : vector<128x128xf32> to vector<128x128xbf16>
    %c0_12 = arith.constant 0 : index
    %c0_13 = arith.constant 0 : index
    %17 = vector.load %arg6[%c0_12, %c0_13] : memref<1x128xbf16, #tpu.memory_space<vmem>>, vector<1x128xbf16>
    %cst_14 = arith.constant dense<0.000000e+00> : vector<1x128xf32>
    %18 = tpu.matmul %17, %16, %cst_14 {dimension_numbers = #tpu.dot_dimension_numbers<[1], [1], [0], [0], [0, 0, 1, 0], [], []>} : vector<1x128xbf16>, vector<128x128xbf16>, vector<1x128xf32> -> vector<1x128xf32>
    %c0_15 = arith.constant 0 : index
    %c0_16 = arith.constant 0 : index
    %19 = vector.load %arg7[%c0_15, %c0_16] : memref<1x1xf32, #tpu.memory_space<vmem>>, vector<1x1xf32>
    %20 = vector.broadcast %19 : vector<1x1xf32> to vector<1x128xf32>
    %21 = arith.addf %18, %20 : vector<1x128xf32>
    %c0_17 = arith.constant 0 : index
    %c0_18 = arith.constant 0 : index
    %22 = vector.load %arg8[%c0_17, %c0_18] : memref<1x128xf32, #tpu.memory_space<vmem>>, vector<1x128xf32>
    tpu.vector_store %arg8[%c0_17, %c0_18], %21 {strides = array<i32>} : memref<1x128xf32, #tpu.memory_space<vmem>>, vector<1x128xf32>,
    return
  }
  func.func @transform_0(%arg0: i32) -> (i32, i32) {
    %c0_i32 = arith.constant 0 : i32
    %c0_i32_0 = arith.constant 0 : i32
    return %arg0, %c0_i32 : i32, i32
  }
  func.func @transform_1(%arg0: i32) -> (i32, i32) {
    %c0_i32 = arith.constant 0 : i32
    %c0_i32_0 = arith.constant 0 : i32
    %c0_i32_1 = arith.constant 0 : i32
    return %c0_i32, %c0_i32_0 : i32, i32
  }
  func.func @transform_2(%arg0: i32) -> (i32, i32) {
    %c0_i32 = arith.constant 0 : i32
    %c0_i32_0 = arith.constant 0 : i32
    %c0_i32_1 = arith.constant 0 : i32
    return %c0_i32, %c0_i32_0 : i32, i32
  }
  func.func @transform_3(%arg0: i32) -> (i32, i32) {
    %c0_i32 = arith.constant 0 : i32
    %c0_i32_0 = arith.constant 0 : i32
    %c0_i32_1 = arith.constant 0 : i32
    return %c0_i32, %c0_i32_0 : i32, i32
  }
  func.func @transform_4(%arg0: i32) -> (i32, i32) {
    %c0_i32 = arith.constant 0 : i32
    %c0_i32_0 = arith.constant 0 : i32
    %c0_i32_1 = arith.constant 0 : i32
    return %c0_i32, %c0_i32_0 : i32, i32
  }
  func.func @transform_5(%arg0: i32) -> (i32, i32) {
    %c0_i32 = arith.constant 0 : i32
    %c0_i32_0 = arith.constant 0 : i32
    %c0_i32_1 = arith.constant 0 : i32
    return %c0_i32, %c0_i32_0 : i32, i32
  }
  func.func @transform_6(%arg0: i32) -> (i32, i32) {
    %c0_i32 = arith.constant 0 : i32
    %c0_i32_0 = arith.constant 0 : i32
    %c0_i32_1 = arith.constant 0 : i32
    return %c0_i32, %c0_i32_0 : i32, i32
  }
  func.func @transform_7(%arg0: i32) -> (i32, i32) {
    %c0_i32 = arith.constant 0 : i32
    %c0_i32_0 = arith.constant 0 : i32
    return %c0_i32, %arg0 : i32, i32
  }
}

</mosaic_0001>

<bundles_post_ra>
// kernel: _lambda_.1
= control target key start
LH: loop header
LB: loop body
LE: loop exit
PB: predicated region body
PF: predicated region fallthrough
CT: control target
= control target key end

     0   :  { %s873_s0 = inlined_call_operand.vmem [shape: bf16[128,128], index: 0, kind: input, shape index: {}]   ;;  %s874_s1 = inlined_call_operand.hbm [shape: bf16[128,128], index: 1, kind: input, shape index: {}]   ;;  %s875_s2 = inlined_call_operand.vmem [shape: f32[1,128], index: 2, kind: input, shape index: {}, may-alias: {2,4}]   ;;  %s876_s3 = inlined_call_operand.vmem [shape: bf16[128,128], index: 3, kind: input, shape index: {}]   ;;  %s877_s4 = inlined_call_operand.vmem [shape: f32[1,128], index: 4, kind: input, shape index: {}, may-alias: {2,4}]   ;;  %s878_s5 = inlined_call_operand.vmem [shape: bf16[1,128], index: 5, kind: input, shape index: {}]   ;;  %s879_s6 = inlined_call_operand.<no memory space> [shape: f32[1,1], index: 6, kind: input, shape index: {}]   ;;  %s880_s7 = inlined_call_operand.vmem [shape: f32[1,128], index: 7, kind: output, shape index: {}]  }
   0x1   :  { %v12_v0 = vstv %s879_s6 }
   0x2   :  { %13 = vst [vmem:[#allocation2] sm:$0x1] %v12_v0 }
   0x3   :  { %14 = vsyncpa [#allocation4], 0  ;;  %s752_s26 = smov [#allocation3]  }
   0x4   :  { %s22_s27 = sshll.u32 %s752_s26, 4  ;;  %s23_s27 = int_to_ptr.vmem [resolvable:$true] %s22_s27 }
   0x5   :  { %s738_s28 = scalar_lea.vmem %s23_s27, 1024  ;;  %p743_p1 = scmp.lt.s32.totalorder %s23_s27, %s23_s27 }
   0x6   :  { %p739_p0 = scmp.ne.s32.totalorder %s23_s27, %s738_s28  ;;  %p744_p2 = scmp.lt.s32.totalorder %s738_s28, %s738_s28 }
   0x8   :  { %p745_p3 = por %p744_p2, %p743_p1 }
   0xa   :  { %p746_p4 = pnand %p745_p3, %p739_p0 }
   0xc   :  { %749 = shalt.err (!%p746_p4)
}
   0xd   :  { %s753_s29 = smov 64   ;;  %s754_s30 = smov 4  }
   0xe   :  { %28 = dma.hbm_to_vmem [thread:$0]  %s874_s1, 1024, %s23_s27, [#allocation4], %s753_s29, %s753_s29, %s754_s30  }
   0xf   :  { %750 = dma.done.wait [#allocation4], 1024  }
  0x10   :  { %751 = vsyncadd [#allocation4], 4294966272  ;;  %v706_v1 = vld [vmem:[#allocation3 + $0x38] sm:$0xff]   ;;  %v707_v2 = vld [vmem:[#allocation3 + $0x30] sm:$0xff]   ;;  %vm756_vm0 = vmmov 0  }
  0x11   :  { %615 = vmatprep.subr.bf16.mxu1 %v706_v1  ;;  %v708_v3 = vld [vmem:[#allocation3 + $0x28] sm:$0xff]   ;;  %v709_v4 = vld [vmem:[#allocation3 + $0x20] sm:$0xff]   ;;  %v710_v6 = vld [vmem:[#allocation3 + $0x18] sm:$0xff]  }
  0x12   :  { %616 = vmatpush3.bf16.msra.mxu1 %v706_v1  ;;  %v714_v5 = vld [vmem:[%s873_s0] sm:$0xff]   ;;  %v711_v7 = vld [vmem:[#allocation3 + $0x10] sm:$0xff]   ;;  %v712_v8 = vld [vmem:[#allocation3 + $0x8] sm:$0xff]  }
  0x13   :  { %617 = vmatprep.subr.bf16.mxu1 %v707_v2  ;;  %631 = vmatprep.mubr.bf16.mxu1 %v714_v5  ;;  %v713_v9 = vld [vmem:[#allocation3] sm:$0xff]   ;;  %v722_v10 = vld [vmem:[%s876_s3 + $0x38] sm:$0xff]   ;;  %v716_v12 = vld [vmem:[%s873_s0 + $0x10] sm:$0xff]  }
  0x14   :  { %v715_v11 = vld [vmem:[%s873_s0 + $0x8] sm:$0xff]   ;;  %v723_v13 = vld [vmem:[%s876_s3 + $0x30] sm:$0xff]   ;;  %v717_v15 = vld [vmem:[%s873_s0 + $0x18] sm:$0xff]  }
  0x15   :  { %v724_v14 = vld [vmem:[%s876_s3 + $0x28] sm:$0xff]   ;;  %v718_v16 = vld [vmem:[%s873_s0 + $0x20] sm:$0xff]   ;;  %v726_v18 = vld [vmem:[%s876_s3 + $0x18] sm:$0xff]  }
  0x16   :  { %618 = vmatpush3.bf16.msra.mxu1 %v707_v2  ;;  %v725_v17 = vld [vmem:[%s876_s3 + $0x20] sm:$0xff]   ;;  %v719_v19 = vld [vmem:[%s873_s0 + $0x28] sm:$0xff]   ;;  %v720_v20 = vld [vmem:[%s873_s0 + $0x30] sm:$0xff]  }
  0x17   :  { %619 = vmatprep.subr.bf16.mxu1 %v708_v3  ;;  %v721_v21 = vld [vmem:[%s873_s0 + $0x38] sm:$0xff]   ;;  %v727_v22 = vld [vmem:[%s876_s3 + $0x10] sm:$0xff]   ;;  %v728_v23 = vld [vmem:[%s876_s3 + $0x8] sm:$0xff]  }
  0x18   :  { %v729_v24 = vld [vmem:[%s876_s3] sm:$0xff]  }
  0x19   :  { %v548_v27 = vld [vmem:[%s875_s2] ss:$0 sm:$0xff] }
  0x1a   :  { %620 = vmatpush3.bf16.msra.mxu1 %v708_v3 }
  0x1b   :  { %621 = vmatprep.subr.bf16.mxu1 %v709_v4 }
  0x1e   :  { %622 = vmatpush3.bf16.msra.mxu1 %v709_v4 }
  0x1f   :  { %623 = vmatprep.subr.bf16.mxu1 %v710_v6 }
  0x22   :  { %624 = vmatpush3.bf16.msra.mxu1 %v710_v6 }
  0x23   :  { %625 = vmatprep.subr.bf16.mxu1 %v711_v7 }
  0x26   :  { %626 = vmatpush3.bf16.msra.mxu1 %v711_v7 }
  0x27   :  { %627 = vmatprep.subr.bf16.mxu1 %v712_v8 }
  0x2a   :  { %628 = vmatpush3.bf16.msra.mxu1 %v712_v8 }
  0x2b   :  { %629 = vmatprep.subr.bf16.mxu1 %v713_v9 }
  0x2e   :  { %630 = vmatpush3.bf16.msra.mxu1 %v713_v9 }
  0x2f   :  { %647 = vmatprep.subr.bf16.mxu1 %v722_v10 }
  0x31   :  { %632 = vmatmul.mubr.bf16.vlgmr.msra.gmra.mxu1 %v715_v11 }
  0x32   :  { %635 = vmatprep.mubr.bf16.mxu1 %v716_v12  ;;  %648 = vmatpush3.bf16.msra.mxu1 %v722_v10 }
  0x33   :  { %649 = vmatprep.subr.bf16.mxu1 %v723_v13 }
  0x36   :  { %650 = vmatpush3.bf16.msra.mxu1 %v723_v13 }
  0x37   :  { %651 = vmatprep.subr.bf16.mxu1 %v724_v14 }
  0x39   :  { %636 = vmatmul.mubr.bf16.gmra.mxu1 %v717_v15 }
  0x3a   :  { %639 = vmatprep.mubr.bf16.mxu1 %v718_v16  ;;  %652 = vmatpush3.bf16.msra.mxu1 %v724_v14 }
  0x3b   :  { %653 = vmatprep.subr.bf16.mxu1 %v725_v17 }
  0x3e   :  { %654 = vmatpush3.bf16.msra.mxu1 %v725_v17 }
  0x3f   :  { %655 = vmatprep.subr.bf16.mxu1 %v726_v18 }
  0x41   :  { %640 = vmatmul.mubr.bf16.gmra.mxu1 %v719_v19  ;;  %v492_v19 = vld [vmem:[#allocation2] sm:$0x1] }
  0x42   :  { %643 = vmatprep.mubr.bf16.mxu1 %v720_v20  ;;  %656 = vmatpush3.bf16.msra.mxu1 %v726_v18  ;;  %v755_v18 = vmov 0.0   ;;  %v757_v20 = vmov 0  }
  0x43   :  { %657 = vmatprep.subr.bf16.mxu1 %v727_v22  ;;  %679 = vmatprep.subr.bf16.mxu0 %v755_v18 }
  0x44   :  { %695 = vmatprep.mubr.msk.bf16.mxu0 %vm756_vm0, %v755_v18  ;;  %705 = vset.pattern.permute.xlu0 %v757_v20 }
  0x45   :  { %495 = vperm.xlu0 %705, %v492_v19  }
  0x46   :  { %658 = vmatpush3.bf16.msra.mxu1 %v727_v22  ;;  %v565_v22 = vld [vmem:[%s877_s4] ss:$0 sm:$0xff] }
  0x47   :  { %659 = vmatprep.subr.bf16.mxu1 %v728_v23 }
  0x49   :  { %644 = vmatmul.mubr.bf16.gmra.mxu1 %v721_v21 }
  0x4a   :  { %660 = vmatpush3.bf16.msra.mxu1 %v728_v23 }
  0x4b   :  { %661 = vmatprep.subr.bf16.mxu1 %v729_v24 }
  0x4e   :  { %662 = vmatpush3.bf16.msra.mxu1 %v729_v24 }
  0xc0   :  { %v496_v19 = vpop.permute.xlu0 %495 }
  0xf1   :  { %v633_v25 = vpop.f32.mrf.mxu1 }
  0xf2   :  { %v221_v31 = vadd.f32 %v633_v25, %v548_v27 }
  0xf3   :  { %v212_v26 = vpop.f32.mrf.mxu1 }
  0xf4   :  { %v213_v29 = vadd.f32 %v548_v27, %v212_v26  ;;  %v277_v38 = vmax.f32 %v221_v31, 0.0 }
  0xf5   :  { %v634_v28 = vpop.f32.mrf.mxu1 }
  0xf6   :  { %v224_v30 = vadd.f32 %v634_v28, %v548_v27  ;;  %v275_v36 = vmax.f32 %v213_v29, 0.0 }
  0xf7   :  { %v215_v32 = vpop.f32.mrf.mxu1 }
  0xf8   :  { %v216_v33 = vadd.f32 %v548_v27, %v215_v32  ;;  %v278_v34 = vmax.f32 %v224_v30, 0.0 }
  0xf9   :  { %v637_v35 = vpop.f32.mrf.mxu1 }
  0xfa   :  { %v276_v37 = vmax.f32 %v216_v33, 0.0  ;;  %v292_v41 = vpack.c.bf16 %v278_v34, %v277_v38  ;;  %v237_v45 = vadd.f32 %v637_v35, %v548_v27 }
  0xfb   :  { %v228_v39 = vpop.f32.mrf.mxu1 }
  0xfc   :  { %v291_v40 = vpack.c.bf16 %v276_v37, %v275_v36  ;;  %v229_v43 = vadd.f32 %v548_v27, %v228_v39  ;;  %v281_v52 = vmax.f32 %v237_v45, 0.0 }
  0xfd   :  { %v638_v42 = vpop.f32.mrf.mxu1 }
  0xfe   :  { %v240_v44 = vadd.f32 %v638_v42, %v548_v27  ;;  %663 = vmatprep.mubr.bf16.mxu1 %v291_v40  ;;  %v279_v50 = vmax.f32 %v229_v43, 0.0 }
  0xff   :  { %v231_v46 = vpop.f32.mrf.mxu1  ;;  %664 = vmatmul.mubr.bf16.vlgmr.msra.gmra.mxu1 %v292_v41 }
 0x100   :  { %v232_v47 = vadd.f32 %v548_v27, %v231_v46  ;;  %v282_v48 = vmax.f32 %v240_v44, 0.0 }
 0x101   :  { %v641_v49 = vpop.f32.mrf.mxu1 }
 0x102   :  { %v280_v51 = vmax.f32 %v232_v47, 0.0  ;;  %v294_v55 = vpack.c.bf16 %v282_v48, %v281_v52  ;;  %v253_v59 = vadd.f32 %v641_v49, %v548_v27 }
 0x103   :  { %v244_v53 = vpop.f32.mrf.mxu1 }
 0x104   :  { %v293_v54 = vpack.c.bf16 %v280_v51, %v279_v50  ;;  %v245_v57 = vadd.f32 %v548_v27, %v244_v53  ;;  %v285_v2 = vmax.f32 %v253_v59, 0.0 }
 0x105   :  { %v642_v56 = vpop.f32.mrf.mxu1 }
 0x106   :  { %v256_v58 = vadd.f32 %v642_v56, %v548_v27  ;;  %667 = vmatprep.mubr.bf16.mxu1 %v293_v54  ;;  %v283_v0 = vmax.f32 %v245_v57, 0.0 }
 0x107   :  { %v247_v60 = vpop.f32.mrf.mxu1  ;;  %668 = vmatmul.mubr.bf16.gmra.mxu1 %v294_v55 }
 0x108   :  { %v248_v61 = vadd.f32 %v548_v27, %v247_v60  ;;  %v286_v62 = vmax.f32 %v256_v58, 0.0 }
 0x109   :  { %v645_v63 = vpop.f32.mrf.mxu1 }
 0x10a   :  { %v284_v1 = vmax.f32 %v248_v61, 0.0  ;;  %v296_v5 = vpack.c.bf16 %v286_v62, %v285_v2  ;;  %v269_v9 = vadd.f32 %v645_v63, %v548_v27 }
 0x10b   :  { %v260_v3 = vpop.f32.mrf.mxu1 }
 0x10c   :  { %v295_v4 = vpack.c.bf16 %v284_v1, %v283_v0  ;;  %v261_v7 = vadd.f32 %v548_v27, %v260_v3  ;;  %v289_v15 = vmax.f32 %v269_v9, 0.0 }
 0x10d   :  { %v646_v6 = vpop.f32.mrf.mxu1 }
 0x10e   :  { %v272_v8 = vadd.f32 %v646_v6, %v548_v27  ;;  %671 = vmatprep.mubr.bf16.mxu1 %v295_v4  ;;  %v287_v13 = vmax.f32 %v261_v7, 0.0 }
 0x10f   :  { %v263_v10 = vpop.f32.mrf.mxu1  ;;  %672 = vmatmul.mubr.bf16.gmra.mxu1 %v296_v5 }
 0x110   :  { %v264_v11 = vadd.f32 %v548_v27, %v263_v10  ;;  %v290_v12 = vmax.f32 %v272_v8, 0.0 }
 0x112   :  { %v288_v14 = vmax.f32 %v264_v11, 0.0  ;;  %v298_v17 = vpack.c.bf16 %v290_v12, %v289_v15  ;;  %v498_v15 = vlaneseq }
 0x114   :  { %v297_v16 = vpack.c.bf16 %v288_v14, %v287_v13  ;;  %v491_v14 = vld [vmem:[%s878_s5] sm:$0x1] }
 0x116   :  { %675 = vmatprep.mubr.bf16.mxu1 %v297_v16  ;;  %v499_v16 = vshrl.u32 %v498_v15, 7 }
 0x117   :  { %676 = vmatmul.mubr.bf16.gmra.mxu1 %v298_v17 }
 0x118   :  { %v500_v17 = vsub.s32 0, %v499_v16 }
 0x11a   :  { %v501_v20 = vrot.slane %v496_v19, %v500_v17 }
 0x1bf   :  { %v665_v21 = vpop.f32.mrf.mxu1 }
 0x1c0   :  { %v413_v24 = vadd.f32 %v665_v21, %v565_v22 }
 0x1c1   :  { %v404_v23 = vpop.f32.mrf.mxu1 }
 0x1c2   :  { %v405_v26 = vadd.f32 %v565_v22, %v404_v23  ;;  %v469_v29 = vmax.f32 %v413_v24, 0.0 }
 0x1c3   :  { %v666_v25 = vpop.f32.mrf.mxu1 }
 0x1c4   :  { %v416_v27 = vadd.f32 %v666_v25, %v565_v22  ;;  %v467_v33 = vmax.f32 %v405_v26, 0.0 }
 0x1c5   :  { %v407_v28 = vpop.f32.mrf.mxu1 }
 0x1c6   :  { %v470_v30 = vmax.f32 %v416_v27, 0.0  ;;  %v408_v31 = vadd.f32 %v565_v22, %v407_v28 }
 0x1c7   :  { %v669_v32 = vpop.f32.mrf.mxu1 }
 0x1c8   :  { %v484_v34 = vpack.c.bf16 %v470_v30, %v469_v29  ;;  %v468_v35 = vmax.f32 %v408_v31, 0.0  ;;  %v429_v5 = vadd.f32 %v669_v32, %v565_v22 }
 0x1c9   :  { %v420_v36 = vpop.f32.mrf.mxu1 }
 0x1ca   :  { %v483_v37 = vpack.c.bf16 %v468_v35, %v467_v33  ;;  %v473_v7 = vmax.f32 %v429_v5, 0.0  ;;  %v421_v10 = vadd.f32 %v565_v22, %v420_v36 }
 0x1cb   :  { %v670_v38 = vpop.f32.mrf.mxu1 }
 0x1cc   :  { %v432_v3 = vadd.f32 %v670_v38, %v565_v22  ;;  %v471_v12 = vmax.f32 %v421_v10, 0.0 }
 0x1cd   :  { %v423_v39 = vpop.f32.mrf.mxu1 }
 0x1ce   :  { %v474_v6 = vmax.f32 %v432_v3, 0.0  ;;  %v424_v9 = vadd.f32 %v565_v22, %v423_v39 }
 0x1cf   :  { %v673_v40 = vpop.f32.mrf.mxu1 }
 0x1d0   :  { %v445_v59 = vadd.f32 %v673_v40, %v565_v22  ;;  %v486_v8 = vpack.c.bf16 %v474_v6, %v473_v7  ;;  %v472_v11 = vmax.f32 %v424_v9, 0.0 }
 0x1d1   :  { %v436_v41 = vpop.f32.mrf.mxu1 }
 0x1d2   :  { %v477_v61 = vmax.f32 %v445_v59, 0.0  ;;  %v437_v0 = vadd.f32 %v565_v22, %v436_v41  ;;  %v485_v13 = vpack.c.bf16 %v472_v11, %v471_v12 }
 0x1d3   :  { %v674_v42 = vpop.f32.mrf.mxu1 }
 0x1d4   :  { %v448_v57 = vadd.f32 %v674_v42, %v565_v22  ;;  %v475_v2 = vmax.f32 %v437_v0, 0.0 }
 0x1d5   :  { %v439_v43 = vpop.f32.mrf.mxu1 }
 0x1d6   :  { %v478_v60 = vmax.f32 %v448_v57, 0.0  ;;  %v440_v63 = vadd.f32 %v565_v22, %v439_v43 }
 0x1d7   :  { %v677_v44 = vpop.f32.mrf.mxu1 }
 0x1d8   :  { %v461_v46 = vadd.f32 %v677_v44, %v565_v22  ;;  %v488_v62 = vpack.c.bf16 %v478_v60, %v477_v61  ;;  %v476_v1 = vmax.f32 %v440_v63, 0.0 }
 0x1d9   :  { %v452_v45 = vpop.f32.mrf.mxu1 }
 0x1da   :  { %v481_v50 = vmax.f32 %v461_v46, 0.0  ;;  %v453_v54 = vadd.f32 %v565_v22, %v452_v45  ;;  %v487_v4 = vpack.c.bf16 %v476_v1, %v475_v2 }
 0x1db   :  { %v678_v47 = vpop.f32.mrf.mxu1 }
 0x1dc   :  { %v464_v48 = vadd.f32 %v678_v47, %v565_v22  ;;  %v479_v56 = vmax.f32 %v453_v54, 0.0 }
 0x1dd   :  { %v455_v49 = vpop.f32.mrf.mxu1 }
 0x1de   :  { %v482_v51 = vmax.f32 %v464_v48, 0.0  ;;  %v456_v52 = vadd.f32 %v565_v22, %v455_v49 }
 0x1e0   :  { %v490_v53 = vpack.c.bf16 %v482_v51, %v481_v50  ;;  %v480_v55 = vmax.f32 %v456_v52, 0.0 }
 0x1e2   :  { %680 = vmatpush3.bf16.xpose.msra.mxu0 %v490_v53  ;;  %v489_v58 = vpack.c.bf16 %v480_v55, %v479_v56 }
 0x1e3   :  { %681 = vmatprep.subr.bf16.mxu0 %v755_v18 }
 0x1ea   :  { %682 = vmatpush3.bf16.xpose.msra.mxu0 %v489_v58 }
 0x1eb   :  { %683 = vmatprep.subr.bf16.mxu0 %v755_v18 }
 0x1f2   :  { %684 = vmatpush3.bf16.xpose.msra.mxu0 %v488_v62 }
 0x1f3   :  { %685 = vmatprep.subr.bf16.mxu0 %v755_v18 }
 0x1fa   :  { %686 = vmatpush3.bf16.xpose.msra.mxu0 %v487_v4 }
 0x1fb   :  { %687 = vmatprep.subr.bf16.mxu0 %v755_v18 }
 0x202   :  { %688 = vmatpush3.bf16.xpose.msra.mxu0 %v486_v8 }
 0x203   :  { %689 = vmatprep.subr.bf16.mxu0 %v755_v18 }
 0x20a   :  { %690 = vmatpush3.bf16.xpose.msra.mxu0 %v485_v13 }
 0x20b   :  { %691 = vmatprep.subr.bf16.mxu0 %v755_v18 }
 0x212   :  { %692 = vmatpush3.bf16.xpose.msra.mxu0 %v484_v34 }
 0x213   :  { %693 = vmatprep.subr.bf16.mxu0 %v755_v18 }
 0x21a   :  { %694 = vmatpush3.bf16.xpose.msra.mxu0 %v483_v37 }
 0x221   :  { %696 = vmatmul.mubr.bf16.vlgmr.msra.gmra.mxu0 %v491_v14 }
 0x2e1   :  { %v536_v21 = vpop.f32.mrf.mxu0 }
 0x2e2   :  { %v537_v22 = vadd.f32 %v536_v21, %v501_v20 }
 0x2e3   :  { %v697_v23 = vpop.f32.mrf.mxu0 }
 0x2e4   :  { %542 = vst [vmem:[%s880_s7] sm:$0x1] %v537_v22 }
 0x2e5   :  { %v539_v24 = vpop.f32.mrf.mxu0 }
 0x2e7   :  { %v698_v18 = vpop.f32.mrf.mxu0 }
 0x2e8   :  { %547 = vsyncpa [#allocation4], 1 }

</bundles_post_ra>
